<compile_context>
chip_gen: v6e
topology: v6e:2x2x1
jax: 0.10.0
libtpu: 0.0.40
codegen_flags: <defaults>
</compile_context>

<pallas_src>
import functools

import jax
import jax.numpy as jnp
from jax.experimental import pallas as pl
from jax.experimental.pallas import tpu as pltpu


def _round_up(x, m):
    return ((x + m - 1) // m) * m


_TM_TARGET = 256                      # row-tile target; pipelines well on all chips
_VMEM_LIMIT = 32 * 1024 * 1024        # safe on v5e/v6e (128 MiB) and v7x (64 MiB)


# ----------------------------------------------------------------------------
# Pallas kernels
# ----------------------------------------------------------------------------
def _conv_kernel(a_ref, w_ref, shift_ref, o_ref, *, relu):
    """Fused: (bf16 patches @ bf16 weight) -> f32, + shift [+ ReLU]."""
    y = jnp.dot(a_ref[...], w_ref[...], preferred_element_type=jnp.float32)
    y = y + shift_ref[...]
    if relu:
        y = jnp.maximum(y, 0.0)
    o_ref[...] = y.astype(o_ref.dtype)


def _conv_res_kernel(a_ref, w_ref, shift_ref, res_ref, o_ref, *, relu):
    """Fused: (bf16 patches @ bf16 weight) -> f32, + shift + residual [+ ReLU]."""
    y = jnp.dot(a_ref[...], w_ref[...], preferred_element_type=jnp.float32)
    y = y + shift_ref[...] + res_ref[...]
    if relu:
        y = jnp.maximum(y, 0.0)
    o_ref[...] = y.astype(o_ref.dtype)


def _conv_dual_kernel(a_ref, w_ref, shift_ref, o1_ref, o2_ref):
    """One MXU pass producing both the main-path conv1 (+BN, +ReLU) and the
    1x1 shortcut conv (no ReLU) of a down-sampling residual block.
    Column split is 128-lane aligned so no relayout is needed."""
    y = jnp.dot(a_ref[...], w_ref[...], preferred_element_type=jnp.float32)
    y = y + shift_ref[...]
    n1 = o1_ref.shape[-1]
    o1_ref[...] = jnp.maximum(y[:, :n1], 0.0).astype(o1_ref.dtype)
    o2_ref[...] = y[:, n1:].astype(o2_ref.dtype)


def _maxpool_kernel(p_ref, o_ref):
    """Max over the 9 window taps (leading axis) of one row tile."""
    o_ref[...] = jnp.max(p_ref[...], axis=0)


# ----------------------------------------------------------------------------
# Fused conv wrappers (tiled over the M = N*Ho*Wo axis)
# ----------------------------------------------------------------------------
def _row_tiling(M):
    TM = min(_TM_TARGET, max(8, _round_up(M, 8)))
    Mp = _round_up(M, TM)
    return TM, Mp


def _fused_conv_bn(patches, wmat, shift, residual, relu):
    """patches (M, K) bf16, wmat (K, N) bf16 (BN scale folded in),
    shift (1, N) f32, residual (M, N) f32 or None.  Returns (M, N) f32."""
    M, K = patches.shape
    N = wmat.shape[1]
    TM, Mp = _row_tiling(M)
    if Mp != M:
        patches = jnp.pad(patches, ((0, Mp - M), (0, 0)))
        if residual is not None:
            residual = jnp.pad(residual, ((0, Mp - M), (0, 0)))

    in_specs = [
        pl.BlockSpec((TM, K), lambda i: (i, 0)),   # row tile of im2col patches
        pl.BlockSpec((K, N), lambda i: (0, 0)),    # weights: resident across grid
        pl.BlockSpec((1, N), lambda i: (0, 0)),    # BN/bias shift: resident
    ]
    args = [patches, wmat, shift]
    bytes_acc = Mp * K * 2 + K * N * 2 + N * 4 + Mp * N * 4
    if residual is not None:
        in_specs.append(pl.BlockSpec((TM, N), lambda i: (i, 0)))
        args.append(residual)
        bytes_acc += Mp * N * 4
        kernel = functools.partial(_conv_res_kernel, relu=relu)
    else:
        kernel = functools.partial(_conv_kernel, relu=relu)

    out = pl.pallas_call(
        kernel,
        out_shape=jax.ShapeDtypeStruct((Mp, N), jnp.float32),
        grid=(Mp // TM,),
        in_specs=in_specs,
        out_specs=pl.BlockSpec((TM, N), lambda i: (i, 0)),
        compiler_params=pltpu.CompilerParams(
            dimension_semantics=("parallel",),
            vmem_limit_bytes=_VMEM_LIMIT,
        ),
        cost_estimate=pl.CostEstimate(
            flops=2 * Mp * K * N, transcendentals=0, bytes_accessed=bytes_acc
        ),
    )(*args)
    return out[:M] if Mp != M else out


def _fused_conv_dual(patches, wmat, shift, n1):
    """Single matmul, two outputs: columns [:n1] get ReLU, columns [n1:] don't."""
    M, K = patches.shape
    N = wmat.shape[1]
    n2 = N - n1
    TM, Mp = _row_tiling(M)
    if Mp != M:
        patches = jnp.pad(patches, ((0, Mp - M), (0, 0)))

    out1, out2 = pl.pallas_call(
        _conv_dual_kernel,
        out_shape=(
            jax.ShapeDtypeStruct((Mp, n1), jnp.float32),
            jax.ShapeDtypeStruct((Mp, n2), jnp.float32),
        ),
        grid=(Mp // TM,),
        in_specs=[
            pl.BlockSpec((TM, K), lambda i: (i, 0)),
            pl.BlockSpec((K, N), lambda i: (0, 0)),
            pl.BlockSpec((1, N), lambda i: (0, 0)),
        ],
        out_specs=(
            pl.BlockSpec((TM, n1), lambda i: (i, 0)),
            pl.BlockSpec((TM, n2), lambda i: (i, 0)),
        ),
        compiler_params=pltpu.CompilerParams(
            dimension_semantics=("parallel",),
            vmem_limit_bytes=_VMEM_LIMIT,
        ),
        cost_estimate=pl.CostEstimate(
            flops=2 * Mp * K * N, transcendentals=0,
            bytes_accessed=Mp * K * 2 + K * N * 2 + N * 4 + Mp * N * 4,
        ),
    )(patches, wmat, shift)
    if Mp != M:
        out1, out2 = out1[:M], out2[:M]
    return out1, out2


# ----------------------------------------------------------------------------
# Glue: im2col, BN folding, layer wrappers
# ----------------------------------------------------------------------------
def _im2col(x_nhwc, kh, kw, stride, pad, pad_value=0.0):
    n, h, w, c = x_nhwc.shape
    xp = jnp.pad(
        x_nhwc, ((0, 0), (pad, pad), (pad, pad), (0, 0)), constant_values=pad_value
    )
    ho = (h + 2 * pad - kh) // stride + 1
    wo = (w + 2 * pad - kw) // stride + 1
    cols = []
    for i in range(kh):
        for j in range(kw):
            cols.append(xp[:, i : i + stride * ho : stride, j : j + stride * wo : stride, :])
    patches = jnp.stack(cols, axis=3)                 # (n, ho, wo, kh*kw, c)
    patches = patches.reshape(n * ho * wo, kh * kw * c)
    return patches, ho, wo


def _fold_bn(b, bn, cout):
    """Returns per-channel (scale, shift) so that bn(conv + b) == scale*conv + shift."""
    if bn is None:
        return jnp.ones((cout,), jnp.float32), b.astype(jnp.float32)
    gamma, beta, rmean, rvar, eps = bn
    s = gamma / jnp.sqrt(rvar + eps)
    shift = ((b - rmean) * s + beta).astype(jnp.float32)
    return s.astype(jnp.float32), shift


def _pad_k(patches, wmat, K):
    Kp = _round_up(K, 128)
    if Kp != K:
        patches = jnp.pad(patches, ((0, 0), (0, Kp - K)))
        wmat = jnp.pad(wmat, ((0, Kp - K), (0, 0)))
    return patches, wmat


def conv_bn_act(x_nhwc, w, b, bn, stride, pad, relu, residual=None):
    """Conv2d (+ optional eval-mode BN) (+ optional residual add) (+ optional ReLU)."""
    cout, cin, kh, kw = w.shape
    n = x_nhwc.shape[0]
    patches, ho, wo = _im2col(x_nhwc, kh, kw, stride, pad)
    M = n * ho * wo
    K = kh * kw * cin

    scale, shift = _fold_bn(b, bn, cout)
    wmat = jnp.transpose(w, (2, 3, 1, 0)).reshape(K, cout).astype(jnp.float32)
    wmat = wmat * scale[None, :]                      # fold BN scale into weights

    patches, wmat = _pad_k(patches, wmat, K)
    res = None if residual is None else residual.reshape(M, cout).astype(jnp.float32)

    out = _fused_conv_bn(
        patches.astype(jnp.bfloat16),                 # bf16 MXU operands, f32 accumulate
        wmat.astype(jnp.bfloat16),
        shift.reshape(1, cout),
        res,
        relu,
    )
    return out.reshape(n, ho, wo, cout)


def conv_dual_downsample(x_nhwc, w1, b1, bn1, w3, b3, stride):
    """Fuses the 3x3/stride-s conv1 (+BN+ReLU) and the 1x1/stride-s shortcut
    conv3 of a down-sampling Residual block into ONE MXU pass.  The 1x1 conv's
    patches are exactly the centre-tap columns of the 3x3 im2col matrix, so its
    weights are embedded (zero elsewhere) into a shared weight matrix."""
    cout, cin, kh, kw = w1.shape
    cout3 = w3.shape[0]
    n = x_nhwc.shape[0]
    patches, ho, wo = _im2col(x_nhwc, kh, kw, stride, pad=1)
    K = kh * kw * cin

    scale1, shift1 = _fold_bn(b1, bn1, cout)
    wmat1 = jnp.transpose(w1, (2, 3, 1, 0)).reshape(K, cout).astype(jnp.float32)
    wmat1 = wmat1 * scale1[None, :]

    centre = (kh // 2) * kw + (kw // 2)               # centre tap (index 4 for 3x3)
    wmat3_small = jnp.transpose(w3, (2, 3, 1, 0)).reshape(cin, cout3).astype(jnp.float32)
    wmat3 = jnp.zeros((K, cout3), jnp.float32)
    wmat3 = wmat3.at[centre * cin:(centre + 1) * cin, :].set(wmat3_small)

    wmat = jnp.concatenate([wmat1, wmat3], axis=1)    # (K, cout + cout3)
    shift = jnp.concatenate([shift1, b3.astype(jnp.float32)]).reshape(1, cout + cout3)

    patches, wmat = _pad_k(patches, wmat, K)

    y, sc = _fused_conv_dual(
        patches.astype(jnp.bfloat16), wmat.astype(jnp.bfloat16), shift, n1=cout
    )
    return y.reshape(n, ho, wo, cout), sc.reshape(n, ho, wo, cout3)


def maxpool_3x3_s2_p1(x_nhwc):
    n, h, w, c = x_nhwc.shape
    xp = jnp.pad(x_nhwc, ((0, 0), (1, 1), (1, 1), (0, 0)),
                 constant_values=-jnp.inf)            # max-pool pads with -inf (PyTorch)
    ho = (h + 2 - 3) // 2 + 1
    wo = (w + 2 - 3) // 2 + 1
    cols = []
    for i in range(3):
        for j in range(3):
            cols.append(xp[:, i : i + 2 * ho : 2, j : j + 2 * wo : 2, :])
    M = n * ho * wo
    p = jnp.stack(cols, axis=0).reshape(9, M, c)

    TM, Mp = _row_tiling(M)
    if Mp != M:
        p = jnp.pad(p, ((0, 0), (0, Mp - M), (0, 0)))  # padded rows sliced off below

    out = pl.pallas_call(
        _maxpool_kernel,
        out_shape=jax.ShapeDtypeStruct((Mp, c), x_nhwc.dtype),
        grid=(Mp // TM,),
        in_specs=[pl.BlockSpec((9, TM, c), lambda i: (0, i, 0))],
        out_specs=pl.BlockSpec((TM, c), lambda i: (i, 0)),
        compiler_params=pltpu.CompilerParams(
            dimension_semantics=("parallel",),
            vmem_limit_bytes=_VMEM_LIMIT,
        ),
        cost_estimate=pl.CostEstimate(
            flops=9 * Mp * c, transcendentals=0,
            bytes_accessed=9 * Mp * c * 4 + Mp * c * 4,
        ),
    )(p)
    out = out[:M] if Mp != M else out
    return out.reshape(n, ho, wo, c)


# ----------------------------------------------------------------------------
# Parameter construction (deterministic, PyTorch-like init)
# ----------------------------------------------------------------------------
def _conv_params(key, cout, cin, kh, kw):
    k1, k2 = jax.random.split(key)
    fan_in = cin * kh * kw
    bound = 1.0 / (fan_in ** 0.5)
    w = jax.random.uniform(k1, (cout, cin, kh, kw), jnp.float32, -bound, bound)
    b = jax.random.uniform(k2, (cout,), jnp.float32, -bound, bound)
    return w, b


def _bn_params(c):
    # gamma, beta, running_mean, running_var, eps  (PyTorch BatchNorm2d defaults)
    return (jnp.ones((c,), jnp.float32), jnp.zeros((c,), jnp.float32),
            jnp.zeros((c,), jnp.float32), jnp.ones((c,), jnp.float32), 1e-5)


def _residual_params(key, cin, cout, use_1x1, stride):
    k1, k2, k3 = jax.random.split(key, 3)
    w1, b1 = _conv_params(k1, cout, cin, 3, 3)
    w2, b2 = _conv_params(k2, cout, cout, 3, 3)
    p = {
        "w1": w1, "b1": b1, "bn1": _bn_params(cout),
        "w2": w2, "b2": b2, "bn2": _bn_params(cout),
        "stride": stride,
        "w3": None, "b3": None,
    }
    if use_1x1:
        w3, b3 = _conv_params(k3, cout, cin, 1, 1)
        p["w3"], p["b3"] = w3, b3
    return p


def init_encoder_params(key):
    keys = jax.random.split(key, 6)
    w1, b1 = _conv_params(keys[0], 64, 1, 7, 7)
    params = {
        "b1": {"w": w1, "b": b1, "bn": _bn_params(64)},
        # resnet_block(64, 64, 2, first_block=True)
        "b2": [
            _residual_params(keys[1], 64, 64, use_1x1=False, stride=1),
            _residual_params(keys[2], 64, 64, use_1x1=False, stride=1),
        ],
        # resnet_block(64, 128, 2)
        "b3": [
            _residual_params(keys[3], 64, 128, use_1x1=True, stride=2),
            _residual_params(keys[4], 128, 128, use_1x1=False, stride=1),
        ],
    }
    return params


# ----------------------------------------------------------------------------
# Forward pass
# ----------------------------------------------------------------------------
def residual_forward(x, p):
    if p["w3"] is not None:
        # Y = relu(bn1(conv1(X)))  and  shortcut = conv3(X)  -- one fused MXU pass
        y, sc = conv_dual_downsample(x, p["w1"], p["b1"], p["bn1"],
                                     p["w3"], p["b3"], stride=p["stride"])
    else:
        y = conv_bn_act(x, p["w1"], p["b1"], p["bn1"],
                        stride=p["stride"], pad=1, relu=True)
        sc = x
    # Y = relu(bn2(conv2(Y)) + shortcut)   -- fused in one Pallas call
    y = conv_bn_act(y, p["w2"], p["b2"], p["bn2"], stride=1, pad=1, relu=True, residual=sc)
    return y


def encoder_forward(x_nchw, params):
    x = jnp.transpose(x_nchw, (0, 2, 3, 1)).astype(jnp.float32)  # NCHW -> NHWC
    # b1: Conv(1->64, k7, s2, p3) + BN + ReLU + MaxPool(k3, s2, p1)
    x = conv_bn_act(x, params["b1"]["w"], params["b1"]["b"], params["b1"]["bn"],
                    stride=2, pad=3, relu=True)
    x = maxpool_3x3_s2_p1(x)
    # b2, b3: residual stages
    for p in params["b2"]:
        x = residual_forward(x, p)
    for p in params["b3"]:
        x = residual_forward(x, p)
    return jnp.transpose(x, (0, 3, 1, 2))  # NHWC -> NCHW


# ----------------------------------------------------------------------------
if __name__ == "__main__":
    key = jax.random.PRNGKey(0)
    k_param, k_data = jax.random.split(key)

    params = init_encoder_params(k_param)
    # Encoder expects 1 input channel (Conv2d(1, 64, ...)).
    x = jax.random.normal(k_data, (2, 1, 16, 16), dtype=jnp.float32)

    out = encoder_forward(x, params)
    out = jax.block_until_ready(out)

    assert out.shape == (2, 128, 2, 2), out.shape
    assert bool(jnp.all(jnp.isfinite(out)))
    print("KERNEL_OK")
</pallas_src>

<mosaic_0001>
module attributes {stable_mosaic.version = 11 : i64} {
  func.func @_conv_kernel(%arg0: i32, %arg1: memref<128x128xbf16, #tpu.memory_space<vmem>>, %arg2: memref<128x64xbf16, #tpu.memory_space<vmem>>, %arg3: memref<1x64xf32, #tpu.memory_space<vmem>>, %arg4: memref<128x64xf32, #tpu.memory_space<vmem>>) attributes {dimension_semantics = [#tpu.dimension_semantics<parallel>], iteration_bounds = array<i64: 1>, scalar_prefetch = 0 : i64, scratch_operands = 0 : i64, tpu.core_type = #tpu.core_type<tc>, window_params = [{transform_indices = @transform_0, window_bounds = array<i64: 128, 128>}, {pipeline_mode = #tpu.pipeline_mode<synchronous>, transform_indices = @transform_1, window_bounds = array<i64: 128, 64>}, {pipeline_mode = #tpu.pipeline_mode<synchronous>, transform_indices = @transform_2, window_bounds = array<i64: 1, 64>}, {transform_indices = @transform_3, window_bounds = array<i64: 128, 64>}]} {
    %c0 = arith.constant 0 : index
    %c0_0 = arith.constant 0 : index
    %0 = vector.load %arg1[%c0, %c0_0] : memref<128x128xbf16, #tpu.memory_space<vmem>>, vector<128x128xbf16>
    %c0_1 = arith.constant 0 : index
    %c0_2 = arith.constant 0 : index
    %1 = vector.load %arg2[%c0_1, %c0_2] : memref<128x64xbf16, #tpu.memory_space<vmem>>, vector<128x64xbf16>
    %cst = arith.constant dense<0.000000e+00> : vector<128x64xf32>
    %2 = tpu.matmul %0, %1, %cst {dimension_numbers = #tpu.dot_dimension_numbers<[1], [0], [0], [1], [0, 0, 1, 1], [], []>} : vector<128x128xbf16>, vector<128x64xbf16>, vector<128x64xf32> -> vector<128x64xf32>
    %c0_3 = arith.constant 0 : index
    %c0_4 = arith.constant 0 : index
    %3 = vector.load %arg3[%c0_3, %c0_4] : memref<1x64xf32, #tpu.memory_space<vmem>>, vector<1x64xf32>
    %4 = vector.broadcast %3 : vector<1x64xf32> to vector<128x64xf32>
    %5 = arith.addf %2, %4 : vector<128x64xf32>
    %cst_5 = arith.constant 0.000000e+00 : f32
    %6 = vector.broadcast %cst_5 : f32 to vector<128x64xf32>
    %7 = arith.maximumf %5, %6 : vector<128x64xf32>
    %c0_6 = arith.constant 0 : index
    %c0_7 = arith.constant 0 : index
    %8 = vector.load %arg4[%c0_6, %c0_7] : memref<128x64xf32, #tpu.memory_space<vmem>>, vector<128x64xf32>
    tpu.vector_store %arg4[%c0_6, %c0_7], %7 {strides = array<i32>} : memref<128x64xf32, #tpu.memory_space<vmem>>, vector<128x64xf32>,
    return
  }
  func.func @transform_0(%arg0: i32) -> (i32, i32) {
    %c0_i32 = arith.constant 0 : i32
    %c0_i32_0 = arith.constant 0 : i32
    return %arg0, %c0_i32 : i32, i32
  }
  func.func @transform_1(%arg0: i32) -> (i32, i32) {
    %c0_i32 = arith.constant 0 : i32
    %c0_i32_0 = arith.constant 0 : i32
    %c0_i32_1 = arith.constant 0 : i32
    return %c0_i32, %c0_i32_0 : i32, i32
  }
  func.func @transform_2(%arg0: i32) -> (i32, i32) {
    %c0_i32 = arith.constant 0 : i32
    %c0_i32_0 = arith.constant 0 : i32
    %c0_i32_1 = arith.constant 0 : i32
    return %c0_i32, %c0_i32_0 : i32, i32
  }
  func.func @transform_3(%arg0: i32) -> (i32, i32) {
    %c0_i32 = arith.constant 0 : i32
    %c0_i32_0 = arith.constant 0 : i32
    return %arg0, %c0_i32 : i32, i32
  }
}

</mosaic_0001>

<bundles_post_ra>
// kernel: tpu_custom_call.1
= control target key start
LH: loop header
LB: loop body
LE: loop exit
PB: predicated region body
PF: predicated region fallthrough
CT: control target
= control target key end

     0   :  { %vm263_vm0 = vcmask 523264   ;;  %s516_s1 = inlined_call_operand.vmem [shape: bf16[128,64], index: 1, kind: input, shape index: {}]   ;;  %s517_s0 = inlined_call_operand.vmem [shape: bf16[128,128], index: 0, kind: input, shape index: {}]   ;;  %s518_s2 = inlined_call_operand.vmem [shape: f32[1,64], index: 2, kind: input, shape index: {}]   ;;  %s519_s3 = inlined_call_operand.vmem [shape: f32[128,64], index: 3, kind: output, shape index: {}]  }
   0x1   :  { %v365_v0 = vld [vmem:[%s516_s1 + $0x38] sm:$0xff]   ;;  %v366_v1 = vld [vmem:[%s516_s1 + $0x30] sm:$0xff]   ;;  %v367_v2 = vld [vmem:[%s516_s1 + $0x28] sm:$0xff]  }
   0x2   :  { %317 = vmatprep.subr.bf16.mxu0 %v365_v0  ;;  %349 = vmatprep.subr.bf16.mxu1 %v365_v0  ;;  %v368_v3 = vld [vmem:[%s516_s1 + $0x20] sm:$0xff]   ;;  %v369_v6 = vld [vmem:[%s516_s1 + $0x18] sm:$0xff]   ;;  %v370_v7 = vld [vmem:[%s516_s1 + $0x10] sm:$0xff]  }
   0x3   :  { %318 = vmatpush3.bf16.msra.mxu0 %v365_v0  ;;  %357 = vmatpush3.bf16.msra.mxu1 %v365_v0  ;;  %v373_v4 = vld [vmem:[%s517_s0] sm:$0xff]   ;;  %v371_v8 = vld [vmem:[%s516_s1 + $0x8] sm:$0xff]   ;;  %v377_v12 = vld [vmem:[%s517_s0 + $0x10] sm:$0xff]  }
   0x4   :  { %319 = vmatprep.subr.bf16.mxu0 %v366_v1  ;;  %350 = vmatprep.subr.bf16.mxu1 %v366_v1  ;;  %v374_v5 = vld [vmem:[%s517_s0 + $0x20] sm:$0xff]   ;;  %v375_v10 = vld [vmem:[%s517_s0 + $0x8] sm:$0xff]   ;;  %v378_v13 = vld [vmem:[%s517_s0 + $0x30] sm:$0xff]  }
   0x5   :  { %333 = vmatprep.mubr.bf16.mxu0 %v373_v4  ;;  %341 = vmatprep.mubr.bf16.mxu1 %v374_v5  ;;  %v372_v9 = vld [vmem:[%s516_s1] sm:$0xff]   ;;  %v376_v11 = vld [vmem:[%s517_s0 + $0x28] sm:$0xff]   ;;  %v379_v14 = vld [vmem:[%s517_s0 + $0x18] sm:$0xff]  }
   0x6   :  { %v380_v15 = vld [vmem:[%s517_s0 + $0x38] sm:$0xff]   ;;  %v284_v16 = vld [vmem:[%s518_s2] ss:$0 sm:$0xff] }
   0x7   :  { %320 = vmatpush3.bf16.msra.mxu0 %v366_v1  ;;  %358 = vmatpush3.bf16.msra.mxu1 %v366_v1 }
   0x8   :  { %321 = vmatprep.subr.bf16.mxu0 %v367_v2  ;;  %351 = vmatprep.subr.bf16.mxu1 %v367_v2 }
   0xb   :  { %322 = vmatpush3.bf16.msra.mxu0 %v367_v2  ;;  %359 = vmatpush3.bf16.msra.mxu1 %v367_v2 }
   0xc   :  { %323 = vmatprep.subr.bf16.mxu0 %v368_v3  ;;  %352 = vmatprep.subr.bf16.mxu1 %v368_v3 }
   0xf   :  { %324 = vmatpush3.bf16.msra.mxu0 %v368_v3  ;;  %360 = vmatpush3.bf16.msra.mxu1 %v368_v3 }
  0x10   :  { %325 = vmatprep.subr.bf16.mxu0 %v369_v6  ;;  %353 = vmatprep.subr.bf16.mxu1 %v369_v6 }
  0x13   :  { %326 = vmatpush3.bf16.msra.mxu0 %v369_v6  ;;  %361 = vmatpush3.bf16.msra.mxu1 %v369_v6 }
  0x14   :  { %327 = vmatprep.subr.bf16.mxu0 %v370_v7  ;;  %354 = vmatprep.subr.bf16.mxu1 %v370_v7 }
  0x17   :  { %328 = vmatpush3.bf16.msra.mxu0 %v370_v7  ;;  %362 = vmatpush3.bf16.msra.mxu1 %v370_v7 }
  0x18   :  { %329 = vmatprep.subr.bf16.mxu0 %v371_v8  ;;  %355 = vmatprep.subr.bf16.mxu1 %v371_v8 }
  0x1b   :  { %330 = vmatpush3.bf16.msra.mxu0 %v371_v8  ;;  %363 = vmatpush3.bf16.msra.mxu1 %v371_v8 }
  0x1c   :  { %331 = vmatprep.subr.bf16.mxu0 %v372_v9  ;;  %356 = vmatprep.subr.bf16.mxu1 %v372_v9 }
  0x1f   :  { %332 = vmatpush3.bf16.msra.mxu0 %v372_v9  ;;  %364 = vmatpush3.bf16.msra.mxu1 %v372_v9 }
  0x22   :  { %334 = vmatmul.mubr.bf16.vlgmr.msra.gmra.mxu0 %v375_v10  ;;  %342 = vmatmul.mubr.bf16.vlgmr.msra.gmra.mxu1 %v376_v11 }
  0x23   :  { %337 = vmatprep.mubr.bf16.mxu0 %v377_v12  ;;  %345 = vmatprep.mubr.bf16.mxu1 %v378_v13 }
  0x2a   :  { %338 = vmatmul.mubr.bf16.gmra.mxu0 %v379_v14  ;;  %346 = vmatmul.mubr.bf16.gmra.mxu1 %v380_v15 }
  0xe2   :  { %v335_v17 = vpop.f32.mrf.mxu0  ;;  %v343_v18 = vpop.f32.mrf.mxu1 }
  0xe3   :  { %v193_v19 = vadd.f32 %v335_v17, %v284_v16  ;;  %v225_v20 = vadd.f32 %v343_v18, %v284_v16 }
  0xe4   :  { %v184_v21 = vpop.f32.mrf.mxu0  ;;  %v216_v22 = vpop.f32.mrf.mxu1 }
  0xe5   :  { %v249_v23 = vmax.f32 %v193_v19, 0.0  ;;  %v257_v24 = vmax.f32 %v225_v20, 0.0  ;;  %v185_v25 = vadd.f32 %v284_v16, %v184_v21  ;;  %v217_v26 = vadd.f32 %v284_v16, %v216_v22 }
  0xe6   :  { %v336_v27 = vpop.f32.mrf.mxu0  ;;  %v344_v28 = vpop.f32.mrf.mxu1 }
  0xe7   :  { %266 = vst.msk [vmem:[%s519_s3 + $0x10] sm:$0xff] %vm263_vm0, %v249_v23  ;;  %274 = vst.msk [vmem:[%s519_s3 + $0x50] sm:$0xff] %vm263_vm0, %v257_v24  ;;  %v247_v29 = vmax.f32 %v185_v25, 0.0  ;;  %v255_v30 = vmax.f32 %v217_v26, 0.0  ;;  %v196_v31 = vadd.f32 %v336_v27, %v284_v16  ;;  %v228_v32 = vadd.f32 %v344_v28, %v284_v16 }
  0xe8   :  { %v187_v33 = vpop.f32.mrf.mxu0  ;;  %v219_v34 = vpop.f32.mrf.mxu1 }
  0xe9   :  { %264 = vst.msk [vmem:[%s519_s3] sm:$0xff] %vm263_vm0, %v247_v29  ;;  %272 = vst.msk [vmem:[%s519_s3 + $0x40] sm:$0xff] %vm263_vm0, %v255_v30  ;;  %v250_v35 = vmax.f32 %v196_v31, 0.0  ;;  %v258_v36 = vmax.f32 %v228_v32, 0.0  ;;  %v188_v37 = vadd.f32 %v284_v16, %v187_v33  ;;  %v220_v38 = vadd.f32 %v284_v16, %v219_v34 }
  0xea   :  { %v339_v39 = vpop.f32.mrf.mxu0  ;;  %v347_v40 = vpop.f32.mrf.mxu1 }
  0xeb   :  { %267 = vst.msk [vmem:[%s519_s3 + $0x18] sm:$0xff] %vm263_vm0, %v250_v35  ;;  %275 = vst.msk [vmem:[%s519_s3 + $0x58] sm:$0xff] %vm263_vm0, %v258_v36  ;;  %v248_v41 = vmax.f32 %v188_v37, 0.0  ;;  %v256_v42 = vmax.f32 %v220_v38, 0.0  ;;  %v209_v43 = vadd.f32 %v339_v39, %v284_v16  ;;  %v241_v44 = vadd.f32 %v347_v40, %v284_v16 }
  0xec   :  { %v200_v45 = vpop.f32.mrf.mxu0  ;;  %v232_v46 = vpop.f32.mrf.mxu1 }
  0xed   :  { %265 = vst.msk [vmem:[%s519_s3 + $0x8] sm:$0xff] %vm263_vm0, %v248_v41  ;;  %273 = vst.msk [vmem:[%s519_s3 + $0x48] sm:$0xff] %vm263_vm0, %v256_v42  ;;  %v253_v47 = vmax.f32 %v209_v43, 0.0  ;;  %v261_v48 = vmax.f32 %v241_v44, 0.0  ;;  %v201_v49 = vadd.f32 %v284_v16, %v200_v45  ;;  %v233_v50 = vadd.f32 %v284_v16, %v232_v46 }
  0xee   :  { %v340_v51 = vpop.f32.mrf.mxu0  ;;  %v348_v52 = vpop.f32.mrf.mxu1 }
  0xef   :  { %270 = vst.msk [vmem:[%s519_s3 + $0x30] sm:$0xff] %vm263_vm0, %v253_v47  ;;  %278 = vst.msk [vmem:[%s519_s3 + $0x70] sm:$0xff] %vm263_vm0, %v261_v48  ;;  %v251_v53 = vmax.f32 %v201_v49, 0.0  ;;  %v259_v54 = vmax.f32 %v233_v50, 0.0  ;;  %v212_v55 = vadd.f32 %v340_v51, %v284_v16  ;;  %v244_v56 = vadd.f32 %v348_v52, %v284_v16 }
  0xf0   :  { %v203_v57 = vpop.f32.mrf.mxu0  ;;  %v235_v58 = vpop.f32.mrf.mxu1 }
  0xf1   :  { %268 = vst.msk [vmem:[%s519_s3 + $0x20] sm:$0xff] %vm263_vm0, %v251_v53  ;;  %276 = vst.msk [vmem:[%s519_s3 + $0x60] sm:$0xff] %vm263_vm0, %v259_v54  ;;  %v254_v59 = vmax.f32 %v212_v55, 0.0  ;;  %v262_v60 = vmax.f32 %v244_v56, 0.0  ;;  %v204_v61 = vadd.f32 %v284_v16, %v203_v57  ;;  %v236_v62 = vadd.f32 %v284_v16, %v235_v58 }
  0xf3   :  { %271 = vst.msk [vmem:[%s519_s3 + $0x38] sm:$0xff] %vm263_vm0, %v254_v59  ;;  %279 = vst.msk [vmem:[%s519_s3 + $0x78] sm:$0xff] %vm263_vm0, %v262_v60  ;;  %v252_v63 = vmax.f32 %v204_v61, 0.0  ;;  %v260_v0 = vmax.f32 %v236_v62, 0.0 }
  0xf5   :  { %269 = vst.msk [vmem:[%s519_s3 + $0x28] sm:$0xff] %vm263_vm0, %v252_v63  ;;  %277 = vst.msk [vmem:[%s519_s3 + $0x68] sm:$0xff] %vm263_vm0, %v260_v0 }

</bundles_post_ra>
